<compile_context>
chip_gen: v7x
topology: tpu7x:2x2x1
jax: 0.10.0
libtpu: 0.0.40
codegen_flags: <defaults>
</compile_context>

<pallas_src>
import math
from functools import partial

import jax
import jax.numpy as jnp
from jax.experimental import pallas as pl
from jax.experimental.pallas import tpu as pltpu

_HALF_LOG_2PI = 0.5 * math.log(2.0 * math.pi)
_MAX_BATCH_TILE = 512      # ~85% of HBM roofline for mem-bound tiles; tiny VMEM footprint


def _policy_kernel(x_ref, w1_ref, b1_ref, w2_ref, b2_ref, w3_ref, b3_ref,
                   sigma_ref, eps_or_act_ref, out_ref, *, use_actions):
    # MLP hot path: bf16 operands on the MXU, f32 accumulate; bias/ReLU on the VPU in f32.
    h = jnp.dot(x_ref[...], w1_ref[...], preferred_element_type=jnp.float32) + b1_ref[...]
    h = jnp.maximum(h, 0.0)
    h = jnp.dot(h.astype(jnp.bfloat16), w2_ref[...],
                preferred_element_type=jnp.float32) + b2_ref[...]
    h = jnp.maximum(h, 0.0)
    mu = jnp.dot(h.astype(jnp.bfloat16), w3_ref[...],
                 preferred_element_type=jnp.float32) + b3_ref[...]

    sigma = sigma_ref[...]                              # [1, A], broadcasts over the batch tile
    inv_sigma = pl.reciprocal(sigma, approx=False)      # exact 1/sigma (training-critical logp)
    log_const = -(jnp.log(sigma) + _HALF_LOG_2PI)       # hoisted [1, A] constant

    if use_actions:                                     # static (trace-time) specialization
        act = eps_or_act_ref[...]                       # log_prob of provided actions
    else:
        act = mu + sigma * eps_or_act_ref[...]          # reparameterized Normal(mu, sigma) sample

    z = (act - mu) * inv_sigma
    logp = -0.5 * (z * z) + log_const

    # Single fused store per tile: [ sample | logp ] along the lane dimension.
    out_ref[...] = jnp.concatenate(
        [act.astype(out_ref.dtype), logp.astype(out_ref.dtype)], axis=-1)


@partial(jax.jit, static_argnames=("use_actions",))
def _policy_pallas(x, w1, b1, w2, b2, w3, b3, sigma, eps_or_act, *, use_actions):
    B, obs = x.shape
    h1 = w1.shape[1]
    h2 = w2.shape[1]
    A = w3.shape[1]

    tb = B if B <= _MAX_BATCH_TILE else _MAX_BATCH_TILE
    grid = (pl.cdiv(B, tb),)

    # bf16 operands for the MXU; halves weight/activation DMA bytes. f32 accumulate in-kernel.
    x16 = x.astype(jnp.bfloat16)
    w1_16 = w1.astype(jnp.bfloat16)
    w2_16 = w2.astype(jnp.bfloat16)
    w3_16 = w3.astype(jnp.bfloat16)

    def batch_spec(d):                   # tiled over batch
        return pl.BlockSpec((tb, d), lambda i: (i, 0))

    def const_spec(shape):               # resident across grid steps
        return pl.BlockSpec(shape, lambda i: (0, 0))

    flops = 2 * B * (obs * h1 + h1 * h2 + h2 * A) + 10 * B * A
    bytes_accessed = (2 * (B * obs + obs * h1 + h1 * h2 + h2 * A)   # bf16 x + weights
                      + 4 * (h1 + h2 + 2 * A)                       # f32 biases + sigma
                      + 4 * B * A                                   # eps / actions in
                      + 4 * B * 2 * A)                              # fused f32 output

    fused = pl.pallas_call(
        partial(_policy_kernel, use_actions=use_actions),
        out_shape=jax.ShapeDtypeStruct((B, 2 * A), jnp.float32),
        grid=grid,
        in_specs=[
            batch_spec(obs),                              # x tile
            const_spec((obs, h1)), const_spec((1, h1)),   # w1, b1
            const_spec((h1, h2)), const_spec((1, h2)),    # w2, b2
            const_spec((h2, A)), const_spec((1, A)),      # w3, b3
            const_spec((1, A)),                           # sigma
            batch_spec(A),                                # eps or provided actions
        ],
        out_specs=batch_spec(2 * A),
        compiler_params=pltpu.CompilerParams(
            dimension_semantics=("parallel",),            # v7x: shard batch tiles across both TCs
            vmem_limit_bytes=32 * 1024 * 1024,            # safe for v7x's 64 MiB VMEM (and v5e/v6e)
        ),
        cost_estimate=pl.CostEstimate(
            flops=flops, transcendentals=4 * A, bytes_accessed=bytes_accessed),
    )(x16, w1_16, b1, w2_16, b2, w3_16, b3, sigma, eps_or_act)

    return fused[:, :A], fused[:, A:]


def continuous_policy_forward(params, x, actions=None, *, key=None):
    """Mirrors ContinuousPolicy.forward(x, actions=None) -> (sample_act, log_prob)."""
    w1, b1, w2, b2, w3, b3, sigma = params
    B = x.shape[0]
    A = w3.shape[1]
    if actions is None:
        assert key is not None, "need a PRNG key to sample"
        eps_or_act = jax.random.normal(key, (B, A), dtype=jnp.float32)
        use_actions = False
    else:
        eps_or_act = actions.astype(jnp.float32)
        use_actions = True
    return _policy_pallas(x, w1, b1, w2, b2, w3, b3, sigma, eps_or_act,
                          use_actions=use_actions)


def init_params(key, observation_dim, hidden_layers, action_dim):
    """Deterministic synthetic parameters for MLP(obs, hidden_layers, action) + sigma."""
    # TODO(synk): widths of 16/32/8 leave the MXU <10% utilized; pad to 128 at the
    # architecture level if the model allows (same MXU pass, 4-16x more useful FLOPs).
    dims = [observation_dim] + list(hidden_layers) + [action_dim]
    keys = jax.random.split(key, 2 * (len(dims) - 1))
    params = []
    for i in range(len(dims) - 1):
        fan_in = dims[i]
        bound = 1.0 / math.sqrt(fan_in)
        w = jax.random.uniform(keys[2 * i], (dims[i], dims[i + 1]),
                               minval=-bound, maxval=bound, dtype=jnp.float32)
        b = jax.random.uniform(keys[2 * i + 1], (1, dims[i + 1]),
                               minval=-bound, maxval=bound, dtype=jnp.float32)
        params += [w, b]
    sigma = jnp.ones((1, action_dim), dtype=jnp.float32)   # nn.Parameter(torch.ones(action_dim))
    return tuple(params) + (sigma,)


def _reference_forward(params, x, eps_or_act, use_actions):
    """Pure-JAX f32 reference for a loose numerical check."""
    w1, b1, w2, b2, w3, b3, sigma = params
    h = jnp.maximum(x @ w1 + b1, 0.0)
    h = jnp.maximum(h @ w2 + b2, 0.0)
    mu = h @ w3 + b3
    act = eps_or_act if use_actions else mu + sigma * eps_or_act
    logp = -0.5 * ((act - mu) / sigma) ** 2 - jnp.log(sigma) - _HALF_LOG_2PI
    return act, logp


if __name__ == "__main__":
    observation_dim, hidden_layers, action_dim = 16, [32, 32], 8
    batch = 8

    root = jax.random.PRNGKey(0)
    k_param, k_x, k_sample, k_act = jax.random.split(root, 4)

    params = init_params(k_param, observation_dim, hidden_layers, action_dim)
    x = jax.random.normal(k_x, (batch, observation_dim), dtype=jnp.float32)

    # Path 1: actions is None -> sample from Normal(mu, sigma)
    sample_act, logp = continuous_policy_forward(params, x, key=k_sample)
    jax.block_until_ready((sample_act, logp))
    assert sample_act.shape == (batch, action_dim)
    assert logp.shape == (batch, action_dim)

    # Path 2: actions provided -> log_prob of the given actions
    given = jax.random.normal(k_act, (batch, action_dim), dtype=jnp.float32)
    act2, logp2 = continuous_policy_forward(params, x, actions=given)
    jax.block_until_ready((act2, logp2))
    assert jnp.allclose(act2, given)

    # Loose check vs f32 reference (kernel matmuls run in bf16 with f32 accumulate).
    ref_act, ref_logp = _reference_forward(params, x, given, use_actions=True)
    assert jnp.allclose(logp2, ref_logp, atol=1e-1, rtol=1e-1)

    print("KERNEL_OK")
</pallas_src>

<mosaic_0001>
module attributes {stable_mosaic.version = 11 : i64} {
  func.func @_policy_kernel(%arg0: i32, %arg1: memref<8x16xbf16, #tpu.memory_space<vmem>>, %arg2: memref<16x32xbf16, #tpu.memory_space<vmem>>, %arg3: memref<1x32xf32, #tpu.memory_space<vmem>>, %arg4: memref<32x32xbf16, #tpu.memory_space<vmem>>, %arg5: memref<1x32xf32, #tpu.memory_space<vmem>>, %arg6: memref<32x8xbf16, #tpu.memory_space<vmem>>, %arg7: memref<1x8xf32, #tpu.memory_space<vmem>>, %arg8: memref<1x8xf32, #tpu.memory_space<vmem>>, %arg9: memref<8x8xf32, #tpu.memory_space<vmem>>, %arg10: memref<8x16xf32, #tpu.memory_space<vmem>>) attributes {dimension_semantics = [#tpu.dimension_semantics<parallel>], iteration_bounds = array<i64: 1>, scalar_prefetch = 0 : i64, scratch_operands = 0 : i64, tpu.core_type = #tpu.core_type<tc>, window_params = [{transform_indices = @transform_0, window_bounds = array<i64: 8, 16>}, {pipeline_mode = #tpu.pipeline_mode<synchronous>, transform_indices = @transform_1, window_bounds = array<i64: 16, 32>}, {pipeline_mode = #tpu.pipeline_mode<synchronous>, transform_indices = @transform_2, window_bounds = array<i64: 1, 32>}, {pipeline_mode = #tpu.pipeline_mode<synchronous>, transform_indices = @transform_3, window_bounds = array<i64: 32, 32>}, {pipeline_mode = #tpu.pipeline_mode<synchronous>, transform_indices = @transform_4, window_bounds = array<i64: 1, 32>}, {pipeline_mode = #tpu.pipeline_mode<synchronous>, transform_indices = @transform_5, window_bounds = array<i64: 32, 8>}, {pipeline_mode = #tpu.pipeline_mode<synchronous>, transform_indices = @transform_6, window_bounds = array<i64: 1, 8>}, {pipeline_mode = #tpu.pipeline_mode<synchronous>, transform_indices = @transform_7, window_bounds = array<i64: 1, 8>}, {transform_indices = @transform_8, window_bounds = array<i64: 8, 8>}, {transform_indices = @transform_9, window_bounds = array<i64: 8, 16>}]} {
    %c0 = arith.constant 0 : index
    %c0_0 = arith.constant 0 : index
    %0 = vector.load %arg1[%c0, %c0_0] : memref<8x16xbf16, #tpu.memory_space<vmem>>, vector<8x16xbf16>
    %c0_1 = arith.constant 0 : index
    %c0_2 = arith.constant 0 : index
    %1 = vector.load %arg2[%c0_1, %c0_2] : memref<16x32xbf16, #tpu.memory_space<vmem>>, vector<16x32xbf16>
    %cst = arith.constant dense<0.000000e+00> : vector<8x32xf32>
    %2 = tpu.matmul %0, %1, %cst {dimension_numbers = #tpu.dot_dimension_numbers<[1], [0], [0], [1], [0, 0, 1, 1], [], []>} : vector<8x16xbf16>, vector<16x32xbf16>, vector<8x32xf32> -> vector<8x32xf32>
    %c0_3 = arith.constant 0 : index
    %c0_4 = arith.constant 0 : index
    %3 = vector.load %arg3[%c0_3, %c0_4] : memref<1x32xf32, #tpu.memory_space<vmem>>, vector<1x32xf32>
    %4 = vector.broadcast %3 : vector<1x32xf32> to vector<8x32xf32>
    %5 = arith.addf %2, %4 : vector<8x32xf32>
    %cst_5 = arith.constant 0.000000e+00 : f32
    %6 = vector.broadcast %cst_5 : f32 to vector<8x32xf32>
    %7 = arith.maximumf %5, %6 : vector<8x32xf32>
    %8 = arith.truncf %7 : vector<8x32xf32> to vector<8x32xbf16>
    %c0_6 = arith.constant 0 : index
    %c0_7 = arith.constant 0 : index
    %9 = vector.load %arg4[%c0_6, %c0_7] : memref<32x32xbf16, #tpu.memory_space<vmem>>, vector<32x32xbf16>
    %cst_8 = arith.constant dense<0.000000e+00> : vector<8x32xf32>
    %10 = tpu.matmul %8, %9, %cst_8 {dimension_numbers = #tpu.dot_dimension_numbers<[1], [0], [0], [1], [0, 0, 1, 1], [], []>} : vector<8x32xbf16>, vector<32x32xbf16>, vector<8x32xf32> -> vector<8x32xf32>
    %c0_9 = arith.constant 0 : index
    %c0_10 = arith.constant 0 : index
    %11 = vector.load %arg5[%c0_9, %c0_10] : memref<1x32xf32, #tpu.memory_space<vmem>>, vector<1x32xf32>
    %12 = vector.broadcast %11 : vector<1x32xf32> to vector<8x32xf32>
    %13 = arith.addf %10, %12 : vector<8x32xf32>
    %cst_11 = arith.constant 0.000000e+00 : f32
    %14 = vector.broadcast %cst_11 : f32 to vector<8x32xf32>
    %15 = arith.maximumf %13, %14 : vector<8x32xf32>
    %16 = arith.truncf %15 : vector<8x32xf32> to vector<8x32xbf16>
    %c0_12 = arith.constant 0 : index
    %c0_13 = arith.constant 0 : index
    %17 = vector.load %arg6[%c0_12, %c0_13] : memref<32x8xbf16, #tpu.memory_space<vmem>>, vector<32x8xbf16>
    %cst_14 = arith.constant dense<0.000000e+00> : vector<8x8xf32>
    %18 = tpu.matmul %16, %17, %cst_14 {dimension_numbers = #tpu.dot_dimension_numbers<[1], [0], [0], [1], [0, 0, 1, 1], [], []>} : vector<8x32xbf16>, vector<32x8xbf16>, vector<8x8xf32> -> vector<8x8xf32>
    %c0_15 = arith.constant 0 : index
    %c0_16 = arith.constant 0 : index
    %19 = vector.load %arg7[%c0_15, %c0_16] : memref<1x8xf32, #tpu.memory_space<vmem>>, vector<1x8xf32>
    %20 = vector.broadcast %19 : vector<1x8xf32> to vector<8x8xf32>
    %21 = arith.addf %18, %20 : vector<8x8xf32>
    %c0_17 = arith.constant 0 : index
    %c0_18 = arith.constant 0 : index
    %22 = vector.load %arg8[%c0_17, %c0_18] : memref<1x8xf32, #tpu.memory_space<vmem>>, vector<1x8xf32>
    %23 = tpu.reciprocal %22 : vector<1x8xf32> -> vector<1x8xf32>
    %24 = math.log %22 : vector<1x8xf32>
    %cst_19 = arith.constant 0.918938517 : f32
    %25 = vector.broadcast %cst_19 : f32 to vector<1x8xf32>
    %26 = arith.addf %24, %25 : vector<1x8xf32>
    %cst_20 = arith.constant 0.000000e+00 : f32
    %27 = vector.broadcast %cst_20 : f32 to vector<1x8xf32>
    %28 = arith.subf %27, %26 : vector<1x8xf32>
    %c0_21 = arith.constant 0 : index
    %c0_22 = arith.constant 0 : index
    %29 = vector.load %arg9[%c0_21, %c0_22] : memref<8x8xf32, #tpu.memory_space<vmem>>, vector<8x8xf32>
    %30 = vector.broadcast %22 : vector<1x8xf32> to vector<8x8xf32>
    %31 = arith.mulf %30, %29 : vector<8x8xf32>
    %32 = arith.addf %21, %31 : vector<8x8xf32>
    %33 = arith.subf %32, %21 : vector<8x8xf32>
    %34 = vector.broadcast %23 : vector<1x8xf32> to vector<8x8xf32>
    %35 = arith.mulf %33, %34 : vector<8x8xf32>
    %36 = arith.mulf %35, %35 : vector<8x8xf32>
    %cst_23 = arith.constant -5.000000e-01 : f32
    %37 = vector.broadcast %cst_23 : f32 to vector<8x8xf32>
    %38 = arith.mulf %37, %36 : vector<8x8xf32>
    %39 = vector.broadcast %28 : vector<1x8xf32> to vector<8x8xf32>
    %40 = arith.addf %38, %39 : vector<8x8xf32>
    %41 = tpu.concatenate %32, %40 in 1 : vector<8x8xf32>, vector<8x8xf32> -> vector<8x16xf32>
    %c0_24 = arith.constant 0 : index
    %c0_25 = arith.constant 0 : index
    %42 = vector.load %arg10[%c0_24, %c0_25] : memref<8x16xf32, #tpu.memory_space<vmem>>, vector<8x16xf32>
    tpu.vector_store %arg10[%c0_24, %c0_25], %41 {strides = array<i32>} : memref<8x16xf32, #tpu.memory_space<vmem>>, vector<8x16xf32>,
    return
  }
  func.func @transform_0(%arg0: i32) -> (i32, i32) {
    %c0_i32 = arith.constant 0 : i32
    %c0_i32_0 = arith.constant 0 : i32
    return %arg0, %c0_i32 : i32, i32
  }
  func.func @transform_1(%arg0: i32) -> (i32, i32) {
    %c0_i32 = arith.constant 0 : i32
    %c0_i32_0 = arith.constant 0 : i32
    %c0_i32_1 = arith.constant 0 : i32
    return %c0_i32, %c0_i32_0 : i32, i32
  }
  func.func @transform_2(%arg0: i32) -> (i32, i32) {
    %c0_i32 = arith.constant 0 : i32
    %c0_i32_0 = arith.constant 0 : i32
    %c0_i32_1 = arith.constant 0 : i32
    return %c0_i32, %c0_i32_0 : i32, i32
  }
  func.func @transform_3(%arg0: i32) -> (i32, i32) {
    %c0_i32 = arith.constant 0 : i32
    %c0_i32_0 = arith.constant 0 : i32
    %c0_i32_1 = arith.constant 0 : i32
    return %c0_i32, %c0_i32_0 : i32, i32
  }
  func.func @transform_4(%arg0: i32) -> (i32, i32) {
    %c0_i32 = arith.constant 0 : i32
    %c0_i32_0 = arith.constant 0 : i32
    %c0_i32_1 = arith.constant 0 : i32
    return %c0_i32, %c0_i32_0 : i32, i32
  }
  func.func @transform_5(%arg0: i32) -> (i32, i32) {
    %c0_i32 = arith.constant 0 : i32
    %c0_i32_0 = arith.constant 0 : i32
    %c0_i32_1 = arith.constant 0 : i32
    return %c0_i32, %c0_i32_0 : i32, i32
  }
  func.func @transform_6(%arg0: i32) -> (i32, i32) {
    %c0_i32 = arith.constant 0 : i32
    %c0_i32_0 = arith.constant 0 : i32
    %c0_i32_1 = arith.constant 0 : i32
    return %c0_i32, %c0_i32_0 : i32, i32
  }
  func.func @transform_7(%arg0: i32) -> (i32, i32) {
    %c0_i32 = arith.constant 0 : i32
    %c0_i32_0 = arith.constant 0 : i32
    %c0_i32_1 = arith.constant 0 : i32
    return %c0_i32, %c0_i32_0 : i32, i32
  }
  func.func @transform_8(%arg0: i32) -> (i32, i32) {
    %c0_i32 = arith.constant 0 : i32
    %c0_i32_0 = arith.constant 0 : i32
    return %arg0, %c0_i32 : i32, i32
  }
  func.func @transform_9(%arg0: i32) -> (i32, i32) {
    %c0_i32 = arith.constant 0 : i32
    %c0_i32_0 = arith.constant 0 : i32
    return %arg0, %c0_i32 : i32, i32
  }
}

</mosaic_0001>

<bundles_post_ra>
// kernel: _policy_pallas.1
= control target key start
LH: loop header
LB: loop body
LE: loop exit
PB: predicated region body
PF: predicated region fallthrough
CT: control target
= control target key end

     0   :  { %v326_v0 = vmov 0.0   ;;  %vm327_vm0 = vmmov 0   ;;  %vm49_vm1 = vcmask 130048   ;;  %vm118_vm2 = vcmask 261120   ;;  %s417_s1 = inlined_call_operand.vmem [shape: bf16[16,32], index: 1, kind: input, shape index: {}]   ;;  %s418_s0 = inlined_call_operand.vmem [shape: bf16[8,16], index: 0, kind: input, shape index: {}]   ;;  %s419_s3 = inlined_call_operand.vmem [shape: bf16[32,32], index: 3, kind: input, shape index: {}]   ;;  %s420_s5 = inlined_call_operand.vmem [shape: bf16[32,8], index: 5, kind: input, shape index: {}]   ;;  %s421_s2 = inlined_call_operand.vmem [shape: f32[1,32], index: 2, kind: input, shape index: {}]   ;;  %s422_s4 = inlined_call_operand.vmem [shape: f32[1,32], index: 4, kind: input, shape index: {}]   ;;  %s423_s7 = inlined_call_operand.vmem [shape: f32[1,8], index: 7, kind: input, shape index: {}]   ;;  %s424_s8 = inlined_call_operand.vmem [shape: f32[8,8], index: 8, kind: input, shape index: {}]   ;;  %s425_s6 = inlined_call_operand.vmem [shape: f32[1,8], index: 6, kind: input, shape index: {}]   ;;  %s426_s9 = inlined_call_operand.vmem [shape: f32[8,16], index: 9, kind: output, shape index: {}]  }
   0x1   :  { %292 = vmatprep.subr.bf16.mxu0 %v326_v0  ;;  %v317_v1 = vld [vmem:[%s417_s1] sm:$0xff]   ;;  %294 = vmatprep.mubr.msk.bf16.mxu0 %vm327_vm0, %v326_v0  ;;  %v319_v4 = vld [vmem:[%s419_s3 + $0x8] sm:$0xff]   ;;  %v238_v24 = vlaneseq  ;;  %vm266_vm3 = vcmask 64512  }
   0x2   :  { %298 = vmatprep.subr.bf16.mxu1 %v326_v0  ;;  %302 = vmatprep.mubr.msk.bf16.mxu1 %vm327_vm0, %v326_v0  ;;  %v33_v2 = vld [vmem:[%s418_s0] sm:$0xf]  ;;  %v321_v14 = vld [vmem:[%s420_s5 + $0x8] sm:$0xff]  }
   0x3   :  { %293 = vmatpush3.bf16.msra.mxu0 %v317_v1  ;;  %v318_v3 = vld [vmem:[%s419_s3] sm:$0xff]   ;;  %v239_v25 = vshrl.u32 %v238_v24, 7 }
   0x4   :  { %306 = vmatprep.subr.bf16.mxu0 %v326_v0  ;;  %299 = vmatpush3.bf16.msra.mxu1 %v318_v3  ;;  %v320_v5 = vld [vmem:[%s420_s5] sm:$0xff]  }
   0x5   :  { %300 = vmatprep.subr.bf16.mxu1 %v326_v0  ;;  %v273_v6 = vld [vmem:[%s421_s2] ss:$0 sm:$0xff]  ;;  %v240_v26 = vsub.s32 0, %v239_v25 }
   0x6   :  { %295 = vmatmul.mubr.msk.bf16.vlgmr.msra.gmra.mrb[0].mxu0 %vm49_vm1, %v33_v2  ;;  %v276_v15 = vld [vmem:[%s422_s4] ss:$0 sm:$0xff] }
   0x7   :  { %310 = vmatprep.mubr.msk.bf16.mxu0 %vm327_vm0, %v326_v0  ;;  %307 = vmatpush3.bf16.msra.mxu0 %v320_v5  ;;  %v230_v23 = vld [vmem:[%s423_s7] sm:$0x1]  ;;  %s328_s7 = smov 8  }
   0x8   :  { %301 = vmatpush3.bf16.msra.mxu1 %v319_v4  ;;  %308 = vmatprep.subr.bf16.mxu0 %v326_v0  ;;  %322 = vlog2.f32 %v230_v23  ;;  %v241_v28 = vrot.slane %v230_v23, %v240_v26  ;;  %v236_v29 = vld [vmem:[%s424_s8] sm:$0xff] }
   0x9   :  { %324 = vrcp.f32 %v230_v23  ;;  %v280_v31 = vld [vmem:[%s425_s6] ss:$0 sm:$0xff] }
   0xa   :  { %v243_v32 = vmul.f32 %v241_v28, %v236_v29 }
   0xb   :  { %309 = vmatpush3.bf16.msra.mxu0 %v321_v14 }
  0x12   :  { %v323_v27 = vpop.eup %322 }
  0x13   :  { %v233_v30 = vmul.f32 0.6931472, %v323_v27  ;;  %v325_v33 = vpop.eup %324 }
  0x14   :  { %v250_v41 = vrot.slane %v325_v33, %v240_v26 }
  0x15   :  { %v234_v37 = vadd.f32 0.9189385, %v233_v30 }
  0x17   :  { %v235_v43 = vsub.f32 0.0, %v234_v37 }
  0x19   :  { %v259_v46 = vrot.slane %v235_v43, %v240_v26 }
  0xd9   :  { %v87_v7 = vpop.f32.mrb[0].mxu0 }
  0xda   :  { %v88_v8 = vadd.f32 %v273_v6, %v87_v7  ;;  %v296_v9 = vpop.f32.mrb[1].mxu0 }
  0xdb   :  { %v90_v10 = vpop.f32.mrb[2].mxu0 }
  0xdc   :  { %v93_v11 = vmax.f32 %v88_v8, 0.0  ;;  %v297_v12 = vpop.f32.mrb[3].mxu0 }
  0xde   :  { %v94_v13 = vpack.c.bf16 %v93_v11, %v93_v11 }
  0xe0   :  { %303 = vmatmul.mubr.msk.bf16.vlgmr.msra.gmra.mrb[0].mxu1 %vm118_vm2, %v94_v13 }
 0x1b3   :  { %v156_v16 = vpop.f32.mrb[0].mxu1 }
 0x1b4   :  { %v157_v17 = vadd.f32 %v276_v15, %v156_v16  ;;  %v304_v18 = vpop.f32.mrb[1].mxu1 }
 0x1b5   :  { %v159_v19 = vpop.f32.mrb[2].mxu1 }
 0x1b6   :  { %v162_v20 = vmax.f32 %v157_v17, 0.0  ;;  %v305_v21 = vpop.f32.mrb[3].mxu1 }
 0x1b8   :  { %v163_v22 = vpack.c.bf16 %v162_v20, %v162_v20 }
 0x1ba   :  { %311 = vmatmul.mubr.msk.bf16.vlgmr.msra.gmra.mrb[4].mxu0 %vm118_vm2, %v163_v22 }
 0x28d   :  { %v224_v34 = vpop.f32.mrb[4].mxu0 }
 0x28e   :  { %v225_v35 = vadd.f32 %v280_v31, %v224_v34  ;;  %v312_v36 = vpop.f32.mrb[5].mxu0 }
 0x28f   :  { %v227_v38 = vpop.f32.mrb[6].mxu0 }
 0x290   :  { %v244_v39 = vadd.f32 %v243_v32, %v225_v35  ;;  %v313_v40 = vpop.f32.mrb[7].mxu0 }
 0x292   :  { %v245_v42 = vsub.f32 %v244_v39, %v225_v35 }
 0x294   :  { %v252_v44 = vmul.f32 %v250_v41, %v245_v42 }
 0x296   :  { %v253_v45 = vmul.f32 %v252_v44, %v252_v44 }
 0x298   :  { %v254_v47 = vmul.f32 -0.5, %v253_v45 }
 0x29a   :  { %v261_v48 = vadd.f32 %v259_v46, %v254_v47 }
 0x29c   :  { %263 = vrot.lane.b32.xlu0 %v261_v48, %s328_s7 }
 0x30e   :  { %v264_v49 = vpop.permute.xlu0 %263 }
 0x30f   :  { %v267_v50 = vsel %vm266_vm3, %v244_v39, %v264_v49 }
 0x310   :  { %268 = vst.msk [vmem:[%s426_s9] sm:$0xff] %vm49_vm1, %v267_v50 }

</bundles_post_ra>
